<compile_context>
chip_gen: v7x
topology: tpu7x:2x2x1
jax: 0.10.0
libtpu: 0.0.40
codegen_flags: <defaults>
</compile_context>

<pallas_src>
import math
from functools import partial

import numpy as np
import jax
import jax.numpy as jnp
from jax.experimental import pallas as pl
from jax.experimental.pallas import tpu as pltpu


def _round_up(n: int, m: int) -> int:
    return ((n + m - 1) // m) * m


def _pick_rows(n_rows: int, row_bytes_vmem: int, target_bytes: int = 2 << 20) -> int:
    """Rows per block: ~target_bytes of VMEM per output block, multiple of 8, clamped."""
    rows = max(8, (target_bytes // max(row_bytes_vmem, 1)) // 8 * 8)
    return min(rows, _round_up(n_rows, 8))


# ----------------------------- reference table (parity buffer only) ----------
def get_embedding(num_embeddings: int, embedding_dim: int, padding_idx=None):
    """Exact port of SinusoidalEmbedding.get_embedding (tensor2tensor style).
    Kept only to mirror the torch module's registered buffer; NOT on the hot path."""
    half_dim = embedding_dim // 2
    scale = math.log(10000.0) / max(half_dim - 1, 1)
    freq = np.exp(np.arange(half_dim, dtype=np.float32) * np.float32(-scale))
    ang = np.arange(num_embeddings, dtype=np.float32)[:, None] * freq[None, :]
    emb = np.concatenate([np.sin(ang), np.cos(ang)], axis=1).reshape(num_embeddings, -1)
    if padding_idx is not None:
        emb[padding_idx, :] = 0.0
    return jnp.asarray(emb, dtype=jnp.float32)


# ----------------------------- Pallas kernels --------------------------------
def _sinusoidal_kernel_rowmajor(idx_ref, freq_ref, out_ref, *, padding_idx):
    # Generic path (used when D_out >= 128 or 128 % D_out != 0).
    # idx_ref : (T, 1)  int32   token/position indices for this tile
    # freq_ref: (1, H)  float32 inverse-frequency row (H = embedding_dim // 2)
    # out_ref : (T, 2H) float32
    idx = idx_ref[...]                                                # (T, 1) int32
    ang = idx.astype(jnp.float32) * freq_ref[...]                     # (T, H)  VPU mul
    emb = jnp.concatenate([jnp.sin(ang), jnp.cos(ang)], axis=-1)      # (T, 2H)
    if padding_idx is not None:
        emb = emb * (idx != padding_idx).astype(jnp.float32)
    out_ref[...] = emb


def _sinusoidal_kernel_packed(idx_ref, selfreq_ref, sel_ref, phase_ref, out_ref, *,
                              padding_idx, R):
    # Lane-dense path: R tokens per 128-lane output row (D_out < 128, 128 % D_out == 0).
    # idx_ref    : (T, R) int32  R consecutive token indices per output row
    # selfreq_ref: (R, W) f32    selfreq[r, l] = freq_pattern[l] if l // D_out == r else 0
    # sel_ref    : (R, W) f32    sel[r, l]     = 1               if l // D_out == r else 0
    # phase_ref  : (1, W) f32    pi/2 on cos lanes, 0 on sin lanes
    # out_ref    : (T, W) f32    W = R * D_out = 128 (unmasked, lane-dense stores)
    idx = idx_ref[...]
    selfreq = selfreq_ref[...]
    phase = phase_ref[...]

    # angle[t, l] = idx[t, l // D_out] * freq_pattern[l]   (other terms multiply by 0.0)
    ang = idx[:, 0:1].astype(jnp.float32) * selfreq[0:1, :]
    for r in range(1, R):
        ang = ang + idx[:, r:r + 1].astype(jnp.float32) * selfreq[r:r + 1, :]

    # cos(x) == sin(x + pi/2): one transcendental per output element.
    val = jnp.sin(ang + phase)

    if padding_idx is not None:
        sel = sel_ref[...]
        keep = (idx[:, 0:1] != padding_idx).astype(jnp.float32) * sel[0:1, :]
        for r in range(1, R):
            keep = keep + (idx[:, r:r + 1] != padding_idx).astype(jnp.float32) * sel[r:r + 1, :]
        val = val * keep                                   # padding rows exactly zero

    out_ref[...] = val


def _packed_constants(H: int, D_out: int, R: int, freq_np: np.ndarray):
    W = R * D_out
    lane = np.arange(W)
    grp = lane // D_out
    m = lane % D_out
    j = np.where(m < H, m, m - H)
    freq_pat = freq_np[j].astype(np.float32)                                 # (W,)
    sel = (grp[None, :] == np.arange(R)[:, None]).astype(np.float32)         # (R, W)
    selfreq = (sel * freq_pat[None, :]).astype(np.float32)                   # (R, W)
    phase = ((m >= H).astype(np.float32) * np.float32(np.pi / 2)).reshape(1, W)
    return selfreq, sel, phase


# ----------------------------- wrapper ---------------------------------------
@partial(jax.jit, static_argnames=("embedding_dim", "padding_idx"))
def sinusoidal_embed(x, *, embedding_dim, padding_idx):
    """concat(sin(x*freq), cos(x*freq)) rows via Pallas. Returns (*x.shape, 2*(D//2)) f32."""
    H = embedding_dim // 2
    D_out = 2 * H
    orig_shape = x.shape
    L = int(np.prod(orig_shape, dtype=np.int64))
    if L == 0:                                   # x.numel() == 0: empty result
        return jnp.zeros((*orig_shape, D_out), jnp.float32)

    scale = math.log(10000.0) / max(H - 1, 1)
    freq_np = np.exp(np.arange(H, dtype=np.float32) * np.float32(-scale)).astype(np.float32)

    idx_flat = x.reshape(L).astype(jnp.int32)
    packed = (D_out < 128) and (128 % D_out == 0)

    if packed:
        R = 128 // D_out
        W = R * D_out                                             # == 128
        n_rows = pl.cdiv(L, R)                                    # token groups
        rows = _pick_rows(n_rows, W * 4)
        n_pad = _round_up(n_rows, rows)
        L_pad = n_pad * R
        if L_pad != L:
            idx_flat = jnp.pad(idx_flat, (0, L_pad - L))          # tail sliced off below
        idx2 = idx_flat.reshape(n_pad, R)
        selfreq, sel, phase = _packed_constants(H, D_out, R, freq_np)

        out = pl.pallas_call(
            partial(_sinusoidal_kernel_packed, padding_idx=padding_idx, R=R),
            out_shape=jax.ShapeDtypeStruct((n_pad, W), jnp.float32),
            grid=(n_pad // rows,),
            in_specs=[
                pl.BlockSpec((rows, R), lambda i: (i, 0)),        # index tile (tiny)
                pl.BlockSpec((R, W), lambda i: (0, 0)),           # selfreq constant
                pl.BlockSpec((R, W), lambda i: (0, 0)),           # sel constant
                pl.BlockSpec((1, W), lambda i: (0, 0)),           # phase constant
            ],
            out_specs=pl.BlockSpec((rows, W), lambda i: (i, 0)),
            compiler_params=pltpu.CompilerParams(dimension_semantics=("parallel",)),
        )(idx2, jnp.asarray(selfreq), jnp.asarray(sel), jnp.asarray(phase))
        out = out.reshape(L_pad, D_out)                           # free: row-major contiguous
    else:
        rows = _pick_rows(L, _round_up(D_out, 128) * 4)
        L_pad = _round_up(L, rows)
        if L_pad != L:
            idx_flat = jnp.pad(idx_flat, (0, L_pad - L))
        idx2 = idx_flat.reshape(L_pad, 1)
        freq2 = jnp.asarray(freq_np.reshape(1, H))

        out = pl.pallas_call(
            partial(_sinusoidal_kernel_rowmajor, padding_idx=padding_idx),
            out_shape=jax.ShapeDtypeStruct((L_pad, D_out), jnp.float32),
            grid=(L_pad // rows,),
            in_specs=[
                pl.BlockSpec((rows, 1), lambda i: (i, 0)),        # index tile (tiny)
                pl.BlockSpec((1, H), lambda i: (0, 0)),           # inv-freq row
            ],
            out_specs=pl.BlockSpec((rows, D_out), lambda i: (i, 0)),
            compiler_params=pltpu.CompilerParams(dimension_semantics=("parallel",)),
        )(idx2, freq2)

    if L_pad != L:
        out = out[:L]
    return out.reshape(*orig_shape, D_out)


# ----------------------------- module wrapper --------------------------------
class SinusoidalEmbedding:
    def __init__(self, embedding_dim, padding_idx, init_size=1024):
        self.embedding_dim = embedding_dim
        self.padding_idx = padding_idx
        self.num_embedding = init_size
        # Parity with the torch module's registered buffer (unused on the hot path).
        self.weights = get_embedding(init_size, embedding_dim, padding_idx)

    def forward(self, x):
        # The analytic kernel returns exactly the row the (grown) sinusoidal table would
        # contain for any index, including indices >= num_embedding, so no table regrowth
        # and no int(x.max()) device->host sync are needed.
        return sinusoidal_embed(x, embedding_dim=self.embedding_dim,
                                padding_idx=self.padding_idx)


# ----------------------------- demo / check ----------------------------------
if __name__ == "__main__":
    key = jax.random.PRNGKey(0)
    padding_idx = 1
    B, S = 2, 8

    x = jax.random.randint(key, (B, S), minval=0, maxval=1024, dtype=jnp.int32)
    x = x.at[0, 0].set(padding_idx)   # padding index present
    x = x.at[1, 3].set(2000)          # index past init_size (original would grow the table)
    x_np = np.asarray(x)

    def numpy_ref(xv, embedding_dim, pad):
        H = embedding_dim // 2
        sc = math.log(10000.0) / max(H - 1, 1)
        fr = np.exp(np.arange(H, dtype=np.float32) * np.float32(-sc)).astype(np.float32)
        ang = (xv.astype(np.float32)[..., None] * fr[None, :]).astype(np.float64)
        ref = np.concatenate([np.sin(ang), np.cos(ang)], axis=-1).astype(np.float32)
        ref[xv == pad] = 0.0
        return ref

    # D=32 exercises the packed lane-dense path; D=256 exercises the generic path.
    for D in (32, 256):
        mod = SinusoidalEmbedding(embedding_dim=D, padding_idx=padding_idx, init_size=1024)
        out = jax.block_until_ready(mod.forward(x))
        ref = numpy_ref(x_np, D, padding_idx)

        assert out.shape == (B, S, 2 * (D // 2)), out.shape
        assert out.dtype == jnp.float32
        np.testing.assert_allclose(np.asarray(out), ref, rtol=0, atol=5e-3)
        # padding rows must be exactly zero
        np.testing.assert_array_equal(np.asarray(out)[x_np == padding_idx], 0.0)

    print("KERNEL_OK")
</pallas_src>

<mosaic_0001>
module attributes {stable_mosaic.version = 11 : i64} {
  func.func @_sinusoidal_kernel_packed(%arg0: i32, %arg1: memref<8x4xi32, #tpu.memory_space<vmem>>, %arg2: memref<4x128xf32, #tpu.memory_space<vmem>>, %arg3: memref<4x128xf32, #tpu.memory_space<vmem>>, %arg4: memref<1x128xf32, #tpu.memory_space<vmem>>, %arg5: memref<8x128xf32, #tpu.memory_space<vmem>>) attributes {dimension_semantics = [#tpu.dimension_semantics<parallel>], iteration_bounds = array<i64: 1>, scalar_prefetch = 0 : i64, scratch_operands = 0 : i64, tpu.core_type = #tpu.core_type<tc>, window_params = [{transform_indices = @transform_0, window_bounds = array<i64: 8, 4>}, {pipeline_mode = #tpu.pipeline_mode<synchronous>, transform_indices = @transform_1, window_bounds = array<i64: 4, 128>}, {pipeline_mode = #tpu.pipeline_mode<synchronous>, transform_indices = @transform_2, window_bounds = array<i64: 4, 128>}, {pipeline_mode = #tpu.pipeline_mode<synchronous>, transform_indices = @transform_3, window_bounds = array<i64: 1, 128>}, {transform_indices = @transform_4, window_bounds = array<i64: 8, 128>}]} {
    %c0 = arith.constant 0 : index
    %c0_0 = arith.constant 0 : index
    %0 = vector.load %arg1[%c0, %c0_0] : memref<8x4xi32, #tpu.memory_space<vmem>>, vector<8x4xi32>
    %c0_1 = arith.constant 0 : index
    %c0_2 = arith.constant 0 : index
    %1 = vector.load %arg2[%c0_1, %c0_2] : memref<4x128xf32, #tpu.memory_space<vmem>>, vector<4x128xf32>
    %c0_3 = arith.constant 0 : index
    %c0_4 = arith.constant 0 : index
    %2 = vector.load %arg4[%c0_3, %c0_4] : memref<1x128xf32, #tpu.memory_space<vmem>>, vector<1x128xf32>
    %3 = vector.extract_strided_slice %0 {offsets = [0, 0], sizes = [8, 1], strides = [1, 1]} : vector<8x4xi32> to vector<8x1xi32>
    %4 = arith.sitofp %3 : vector<8x1xi32> to vector<8x1xf32>
    %5 = vector.extract_strided_slice %1 {offsets = [0, 0], sizes = [1, 128], strides = [1, 1]} : vector<4x128xf32> to vector<1x128xf32>
    %6 = vector.broadcast %4 : vector<8x1xf32> to vector<8x128xf32>
    %7 = vector.broadcast %5 : vector<1x128xf32> to vector<8x128xf32>
    %8 = arith.mulf %6, %7 : vector<8x128xf32>
    %9 = vector.extract_strided_slice %0 {offsets = [0, 1], sizes = [8, 1], strides = [1, 1]} : vector<8x4xi32> to vector<8x1xi32>
    %10 = arith.sitofp %9 : vector<8x1xi32> to vector<8x1xf32>
    %11 = vector.extract_strided_slice %1 {offsets = [1, 0], sizes = [1, 128], strides = [1, 1]} : vector<4x128xf32> to vector<1x128xf32>
    %12 = vector.broadcast %10 : vector<8x1xf32> to vector<8x128xf32>
    %13 = vector.broadcast %11 : vector<1x128xf32> to vector<8x128xf32>
    %14 = arith.mulf %12, %13 : vector<8x128xf32>
    %15 = arith.addf %8, %14 : vector<8x128xf32>
    %16 = vector.extract_strided_slice %0 {offsets = [0, 2], sizes = [8, 1], strides = [1, 1]} : vector<8x4xi32> to vector<8x1xi32>
    %17 = arith.sitofp %16 : vector<8x1xi32> to vector<8x1xf32>
    %18 = vector.extract_strided_slice %1 {offsets = [2, 0], sizes = [1, 128], strides = [1, 1]} : vector<4x128xf32> to vector<1x128xf32>
    %19 = vector.broadcast %17 : vector<8x1xf32> to vector<8x128xf32>
    %20 = vector.broadcast %18 : vector<1x128xf32> to vector<8x128xf32>
    %21 = arith.mulf %19, %20 : vector<8x128xf32>
    %22 = arith.addf %15, %21 : vector<8x128xf32>
    %23 = vector.extract_strided_slice %0 {offsets = [0, 3], sizes = [8, 1], strides = [1, 1]} : vector<8x4xi32> to vector<8x1xi32>
    %24 = arith.sitofp %23 : vector<8x1xi32> to vector<8x1xf32>
    %25 = vector.extract_strided_slice %1 {offsets = [3, 0], sizes = [1, 128], strides = [1, 1]} : vector<4x128xf32> to vector<1x128xf32>
    %26 = vector.broadcast %24 : vector<8x1xf32> to vector<8x128xf32>
    %27 = vector.broadcast %25 : vector<1x128xf32> to vector<8x128xf32>
    %28 = arith.mulf %26, %27 : vector<8x128xf32>
    %29 = arith.addf %22, %28 : vector<8x128xf32>
    %30 = vector.broadcast %2 : vector<1x128xf32> to vector<8x128xf32>
    %31 = arith.addf %29, %30 : vector<8x128xf32>
    %32 = math.sin %31 : vector<8x128xf32>
    %c0_5 = arith.constant 0 : index
    %c0_6 = arith.constant 0 : index
    %33 = vector.load %arg3[%c0_5, %c0_6] : memref<4x128xf32, #tpu.memory_space<vmem>>, vector<4x128xf32>
    %34 = vector.extract_strided_slice %0 {offsets = [0, 0], sizes = [8, 1], strides = [1, 1]} : vector<8x4xi32> to vector<8x1xi32>
    %c1_i32 = arith.constant 1 : i32
    %35 = vector.broadcast %c1_i32 : i32 to vector<8x1xi32>
    %36 = arith.cmpi ne, %34, %35 : vector<8x1xi32>
    %37 = arith.extui %36 : vector<8x1xi1> to vector<8x1xi32>
    %38 = arith.sitofp %37 : vector<8x1xi32> to vector<8x1xf32>
    %39 = vector.extract_strided_slice %33 {offsets = [0, 0], sizes = [1, 128], strides = [1, 1]} : vector<4x128xf32> to vector<1x128xf32>
    %40 = vector.broadcast %38 : vector<8x1xf32> to vector<8x128xf32>
    %41 = vector.broadcast %39 : vector<1x128xf32> to vector<8x128xf32>
    %42 = arith.mulf %40, %41 : vector<8x128xf32>
    %43 = vector.extract_strided_slice %0 {offsets = [0, 1], sizes = [8, 1], strides = [1, 1]} : vector<8x4xi32> to vector<8x1xi32>
    %c1_i32_7 = arith.constant 1 : i32
    %44 = vector.broadcast %c1_i32_7 : i32 to vector<8x1xi32>
    %45 = arith.cmpi ne, %43, %44 : vector<8x1xi32>
    %46 = arith.extui %45 : vector<8x1xi1> to vector<8x1xi32>
    %47 = arith.sitofp %46 : vector<8x1xi32> to vector<8x1xf32>
    %48 = vector.extract_strided_slice %33 {offsets = [1, 0], sizes = [1, 128], strides = [1, 1]} : vector<4x128xf32> to vector<1x128xf32>
    %49 = vector.broadcast %47 : vector<8x1xf32> to vector<8x128xf32>
    %50 = vector.broadcast %48 : vector<1x128xf32> to vector<8x128xf32>
    %51 = arith.mulf %49, %50 : vector<8x128xf32>
    %52 = arith.addf %42, %51 : vector<8x128xf32>
    %53 = vector.extract_strided_slice %0 {offsets = [0, 2], sizes = [8, 1], strides = [1, 1]} : vector<8x4xi32> to vector<8x1xi32>
    %c1_i32_8 = arith.constant 1 : i32
    %54 = vector.broadcast %c1_i32_8 : i32 to vector<8x1xi32>
    %55 = arith.cmpi ne, %53, %54 : vector<8x1xi32>
    %56 = arith.extui %55 : vector<8x1xi1> to vector<8x1xi32>
    %57 = arith.sitofp %56 : vector<8x1xi32> to vector<8x1xf32>
    %58 = vector.extract_strided_slice %33 {offsets = [2, 0], sizes = [1, 128], strides = [1, 1]} : vector<4x128xf32> to vector<1x128xf32>
    %59 = vector.broadcast %57 : vector<8x1xf32> to vector<8x128xf32>
    %60 = vector.broadcast %58 : vector<1x128xf32> to vector<8x128xf32>
    %61 = arith.mulf %59, %60 : vector<8x128xf32>
    %62 = arith.addf %52, %61 : vector<8x128xf32>
    %63 = vector.extract_strided_slice %0 {offsets = [0, 3], sizes = [8, 1], strides = [1, 1]} : vector<8x4xi32> to vector<8x1xi32>
    %c1_i32_9 = arith.constant 1 : i32
    %64 = vector.broadcast %c1_i32_9 : i32 to vector<8x1xi32>
    %65 = arith.cmpi ne, %63, %64 : vector<8x1xi32>
    %66 = arith.extui %65 : vector<8x1xi1> to vector<8x1xi32>
    %67 = arith.sitofp %66 : vector<8x1xi32> to vector<8x1xf32>
    %68 = vector.extract_strided_slice %33 {offsets = [3, 0], sizes = [1, 128], strides = [1, 1]} : vector<4x128xf32> to vector<1x128xf32>
    %69 = vector.broadcast %67 : vector<8x1xf32> to vector<8x128xf32>
    %70 = vector.broadcast %68 : vector<1x128xf32> to vector<8x128xf32>
    %71 = arith.mulf %69, %70 : vector<8x128xf32>
    %72 = arith.addf %62, %71 : vector<8x128xf32>
    %73 = arith.mulf %32, %72 : vector<8x128xf32>
    %c0_10 = arith.constant 0 : index
    %c0_11 = arith.constant 0 : index
    %74 = vector.load %arg5[%c0_10, %c0_11] : memref<8x128xf32, #tpu.memory_space<vmem>>, vector<8x128xf32>
    tpu.vector_store %arg5[%c0_10, %c0_11], %73 {strides = array<i32>} : memref<8x128xf32, #tpu.memory_space<vmem>>, vector<8x128xf32>,
    return
  }
  func.func @transform_0(%arg0: i32) -> (i32, i32) {
    %c0_i32 = arith.constant 0 : i32
    %c0_i32_0 = arith.constant 0 : i32
    return %arg0, %c0_i32 : i32, i32
  }
  func.func @transform_1(%arg0: i32) -> (i32, i32) {
    %c0_i32 = arith.constant 0 : i32
    %c0_i32_0 = arith.constant 0 : i32
    %c0_i32_1 = arith.constant 0 : i32
    return %c0_i32, %c0_i32_0 : i32, i32
  }
  func.func @transform_2(%arg0: i32) -> (i32, i32) {
    %c0_i32 = arith.constant 0 : i32
    %c0_i32_0 = arith.constant 0 : i32
    %c0_i32_1 = arith.constant 0 : i32
    return %c0_i32, %c0_i32_0 : i32, i32
  }
  func.func @transform_3(%arg0: i32) -> (i32, i32) {
    %c0_i32 = arith.constant 0 : i32
    %c0_i32_0 = arith.constant 0 : i32
    %c0_i32_1 = arith.constant 0 : i32
    return %c0_i32, %c0_i32_0 : i32, i32
  }
  func.func @transform_4(%arg0: i32) -> (i32, i32) {
    %c0_i32 = arith.constant 0 : i32
    %c0_i32_0 = arith.constant 0 : i32
    return %arg0, %c0_i32 : i32, i32
  }
}

</mosaic_0001>

<bundles_post_ra>
// kernel: sinusoidal_embed.1
= control target key start
LH: loop header
LB: loop body
LE: loop exit
PB: predicated region body
PF: predicated region fallthrough
CT: control target
= control target key end

     0   :  { %v254_v0 = vmov 2   ;;  %v255_v1 = vmov 0   ;;  %v256_v4 = vmov 3   ;;  %v257_v5 = vmov 1   ;;  %s329_s0 = inlined_call_operand.vmem [shape: s32[8,4], index: 0, kind: input, shape index: {}]   ;;  %s330_s1 = inlined_call_operand.vmem [shape: f32[4,128], index: 1, kind: input, shape index: {}]   ;;  %s331_s2 = inlined_call_operand.vmem [shape: f32[4,128], index: 2, kind: input, shape index: {}]   ;;  %s332_s3 = inlined_call_operand.vmem [shape: f32[1,128], index: 3, kind: input, shape index: {}]   ;;  %s333_s4 = inlined_call_operand.vmem [shape: f32[8,128], index: 4, kind: output, shape index: {}]  }
   0x1   :  { %245 = vset.pattern.permute.xlu1 %v254_v0  ;;  %243 = vset.pattern.permute.xlu0 %v255_v1  ;;  %v17_v2 = vld [vmem:[%s329_s0] sm:$0xff]  ;;  %v258_v6 = vmov 0.0   ;;  %v26_v8 = vlaneseq  ;;  %v259_v59 = vmov 2102212464   ;;  %v260_v61 = vmov 920167782  }
   0x2   :  { %v20_v3 = vcvt.s32.f32 %v17_v2  ;;  %vm173_vm0 = vcmp.ne.s32.totalorder %v17_v2, 1  ;;  %v18_v12 = vld [vmem:[%s330_s1] sm:$0xf] }
   0x3   :  { %v227_v7 = vsel %vm173_vm0, 1.0, %v258_v6  ;;  %v27_v9 = vshrl.u32 %v26_v8, 7  ;;  %v172_v19 = vld [vmem:[%s331_s2] sm:$0xf]  ;;  %v264_v8 = vmov 2131351028  }
   0x4   :  { %42 = vperm.xlu1 %245, %v20_v3   ;;  %23 = vperm.xlu0 %243, %v20_v3   ;;  %v222_v35 = vld [vmem:[%s332_s3] ss:$0 sm:$0xff] }
   0x5   :  { %v28_v10 = vsub.s32 0, %v27_v9  ;;  %v37_v11 = vsub.s32 1, %v27_v9  ;;  %v47_v14 = vsub.s32 2, %v27_v9  ;;  %v57_v16 = vsub.s32 3, %v27_v9 }
   0x7   :  { %v29_v17 = vrot.slane %v18_v12, %v28_v10  ;;  %v38_v18 = vrot.slane %v18_v12, %v37_v11  ;;  %v48_v20 = vrot.slane %v18_v12, %v47_v14  ;;  %v58_v21 = vrot.slane %v18_v12, %v57_v16 }
   0x8   :  { %246 = vset.pattern.permute.xlu1 %v256_v4  ;;  %244 = vset.pattern.permute.xlu0 %v257_v5  ;;  %v193_v26 = vrot.slane %v172_v19, %v37_v11  ;;  %v184_v27 = vrot.slane %v172_v19, %v28_v10  ;;  %v203_v38 = vrot.slane %v172_v19, %v47_v14  ;;  %v263_v5 = vmov 2475754826  }
   0x9   :  { %52 = vperm.xlu1 %246, %v20_v3   ;;  %32 = vperm.xlu0 %244, %v20_v3   ;;  %v213_v39 = vrot.slane %v172_v19, %v57_v16  ;;  %v262_v3 = vmov 683565275  }
   0xd   :  { %247 = vset.pattern.permute.xlu1 %v255_v1  ;;  %187 = vperm.xlu0 %244, %v227_v7   ;;  %v261_v1 = vmov 1326507024  }
   0xe   :  { %178 = vperm.xlu1 %247, %v227_v7  }
  0x11   :  { %249 = vset.pattern.permute.xlu0 %v256_v4 }
  0x12   :  { %248 = vset.pattern.permute.xlu1 %v254_v0  ;;  %207 = vperm.xlu0 %249, %v227_v7  }
  0x13   :  { %197 = vperm.xlu1 %248, %v227_v7  }
  0x83   :  { %v24_v13 = vpop.permute.xlu0 %23  ;;  %v43_v15 = vpop.permute.xlu1 %42 }
  0x84   :  { %v30_v24 = vmul.f32 %v29_v17, %v24_v13  ;;  %v49_v28 = vmul.f32 %v48_v20, %v43_v15 }
  0x88   :  { %v33_v22 = vpop.permute.xlu0 %32  ;;  %v53_v23 = vpop.permute.xlu1 %52 }
  0x89   :  { %v39_v25 = vmul.f32 %v38_v18, %v33_v22  ;;  %v59_v30 = vmul.f32 %v58_v21, %v53_v23 }
  0x8b   :  { %v40_v29 = vadd.f32 %v39_v25, %v30_v24 }
  0x8c   :  { %v188_v31 = vpop.permute.xlu0 %187 }
  0x8d   :  { %v50_v32 = vadd.f32 %v49_v28, %v40_v29  ;;  %v194_v33 = vmul.f32 %v193_v26, %v188_v31  ;;  %v179_v34 = vpop.permute.xlu1 %178 }
  0x8e   :  { %v185_v36 = vmul.f32 %v184_v27, %v179_v34 }
  0x8f   :  { %v60_v37 = vadd.f32 %v59_v30, %v50_v32 }
  0x90   :  { %v195_v40 = vadd.f32 %v194_v33, %v185_v36 }
  0x91   :  { %v302_v41 = vadd.f32 %v222_v35, %v60_v37  ;;  %v208_v42 = vpop.permute.xlu0 %207 }
  0x92   :  { %v198_v43 = vpop.permute.xlu1 %197  ;;  %v214_v46 = vmul.f32 %v213_v39, %v208_v42 }
  0x93   :  { %v71_v44 = vand.u32 2139095040, %v302_v41  ;;  %v204_v45 = vmul.f32 %v203_v38, %v198_v43  ;;  %v68_v47 = vand.u32 2147483647, %v302_v41  ;;  %vm70_vm8 = vcmp.lt.s32.totalorder %v302_v41, 0 }
  0x94   :  { %vm160_vm13 = vweird.f32 %v302_v41 }
  0x95   :  { %v72_v48 = vshrl.u32 %v71_v44, 23  ;;  %v205_v49 = vadd.f32 %v204_v45, %v195_v40  ;;  %v75_v52 = vand.u32 8388607, %v68_v47  ;;  %vm69_vm9 = vcmp.le.f32.partialorder %v68_v47, 0.7853982 }
  0x97   :  { %v223_v50 = vadd.s32 4294967169, %v72_v48  ;;  %v306_v51 = vadd.f32 %v214_v46, %v205_v49  ;;  %v76_v55 = vor.u32 8388608, %v75_v52 }
  0x99   :  { %v78_v53 = vadd.s32 1, %v223_v50  ;;  %v116_v63 = vshll.u32 %v76_v55, 8 }
  0x9b   :  { %vm79_vm1 = vcmp.gt.s32.totalorder %v78_v53, 0 }
  0x9c   :  { %v80_v54 = vsel %vm79_vm1, %v78_v53, 0 }
  0x9d   :  { %v82_v56 = vand.u32 31, %v80_v54  ;;  %v81_v57 = vshrl.u32 %v80_v54, 5 }
  0x9f   :  { %v83_v58 = vsub.s32 32, %v82_v56  ;;  %v94_v60 = vshll.u32 %v259_v59, %v82_v56  ;;  %v97_v62 = vshll.u32 %v260_v61, %v82_v56  ;;  %v85_v4 = vshll.u32 %v262_v3, %v82_v56 }
  0xa0   :  { %v88_v7 = vshll.u32 %v263_v5, %v82_v56  ;;  %v91_v10 = vshll.u32 %v264_v8, %v82_v56  ;;  %vm103_vm2 = vcmp.lt.s32.totalorder %v81_v57, 4  ;;  %vm100_vm3 = vcmp.lt.s32.totalorder %v81_v57, 1 }
  0xa1   :  { %v95_v0 = vshrl.u32 %v260_v61, %v83_v58  ;;  %v98_v2 = vshrl.u32 %v261_v1, %v83_v58  ;;  %v86_v6 = vshrl.u32 %v263_v5, %v83_v58  ;;  %v89_v9 = vshrl.u32 %v264_v8, %v83_v58 }
  0xa2   :  { %v92_v11 = vshrl.u32 %v259_v59, %v83_v58  ;;  %v84_v15 = vshrl.u32 %v262_v3, %v83_v58  ;;  %vm101_vm4 = vcmp.lt.s32.totalorder %v81_v57, 2  ;;  %vm102_vm5 = vcmp.lt.s32.totalorder %v81_v57, 3 }
  0xa3   :  { %v96_v12 = vor.u32 %v95_v0, %v94_v60  ;;  %v99_v13 = vor.u32 %v98_v2, %v97_v62  ;;  %v87_v14 = vor.u32 %v86_v6, %v85_v4  ;;  %v90_v16 = vor.u32 %v89_v9, %v88_v7 }
  0xa4   :  { %v93_v17 = vor.u32 %v92_v11, %v91_v10 }
  0xa5   :  { %v109_v18 = vsel %vm103_vm2, %v96_v12, 920167782  ;;  %v113_v19 = vsel %vm103_vm2, %v99_v13, 1326507024  ;;  %v108_v21 = vsel %vm100_vm3, %v87_v14, %v90_v16  ;;  %v104_v24 = vsel %vm100_vm3, %v84_v15, %v87_v14 }
  0xa6   :  { %v105_v20 = vsel %vm103_vm2, %v93_v17, 2102212464  ;;  %v110_v22 = vsel %vm102_vm5, %v93_v17, %v109_v18  ;;  %v112_v23 = vsel %vm100_vm3, %v90_v16, %v93_v17  ;;  %v114_v27 = vsel %vm102_vm5, %v96_v12, %v113_v19 }
  0xa7   :  { %v106_v25 = vsel %vm102_vm5, %v90_v16, %v105_v20  ;;  %v111_v26 = vsel %vm101_vm4, %v108_v21, %v110_v22  ;;  %v115_v28 = vsel %vm101_vm4, %v112_v23, %v114_v27 }
  0xa8   :  { %v310_v29 = vmul.u32.u64.low %v116_v63, %v111_v26  ;;  %v311_v30 = vmul.u32.u64.high %v116_v63, %v111_v26, %v310_v29  ;;  %v313_v31 = vmul.u32.u64.low %v116_v63, %v115_v28  ;;  %v314_v32 = vmul.u32.u64.high %v116_v63, %v115_v28, %v313_v31 }
  0xa9   :  { %v107_v33 = vsel %vm101_vm4, %v104_v24, %v106_v25 }
  0xaa   :  { %v126_v34 = vadd.s32 1, %v311_v30  ;;  %v123_v35 = vmul.u32 %v116_v63, %v107_v33  ;;  %vm125_vm6 = vc.u32 %v314_v32, %v310_v29  ;;  %v124_v49 = vadd.s32 %v310_v29, %v314_v32 }
  0xac   :  { %v127_v36 = vsel %vm125_vm6, %v126_v34, %v311_v30 }
  0xad   :  { %v128_v37 = vadd.s32 %v127_v36, %v123_v35 }
  0xaf   :  { %v129_v38 = vadd.s32 536870912, %v128_v37 }
  0xb1   :  { %v130_v39 = vshrl.u32 %v129_v38, 30 }
  0xb3   :  { %v131_v40 = vshll.u32 %v130_v39, 30  ;;  %v154_v62 = vsub.s32 4, %v130_v39 }
  0xb5   :  { %v132_v42 = vsub.s32 %v128_v37, %v131_v40  ;;  %v155_v1 = vsel %vm70_vm8, %v154_v62, %v130_v39 }
  0xb6   :  { %v157_v3 = vsel %vm69_vm9, 0, %v155_v1 }
  0xb7   :  { %v134_v43 = vsub.s32 0, %v132_v42  ;;  %v161_v4 = vadd.s32 3, %v157_v3 }
  0xb9   :  { %v224_v44 = vmin.u32 %v134_v43, %v132_v42  ;;  %v162_v5 = vand.u32 3, %v161_v4 }
  0xbb   :  { %v136_v45 = vclz %v224_v44  ;;  %vm167_vm10 = vcmp.eq.s32.totalorder %v162_v5, 2  ;;  %vm164_vm11 = vcmp.eq.s32.totalorder %v162_v5, 0  ;;  %vm163_vm12 = vcmp.lt.s32.totalorder %v162_v5, 2 }
  0xbd   :  { %v225_v46 = vadd.s32 4294967294, %v136_v45 }
  0xbf   :  { %vm226_vm7 = vcmp.lt.s32.totalorder %v225_v46, 0 }
  0xc0   :  { %v139_v48 = vsel %vm226_vm7, 0, %v225_v46 }
  0xc1   :  { %v140_v50 = vsub.s32 32, %v139_v48  ;;  %v144_v52 = vsub.s32 4294967266, %v139_v48  ;;  %v141_v53 = vshll.u32 %v132_v42, %v139_v48 }
  0xc3   :  { %v142_v54 = vshrl.u32 %v124_v49, %v140_v50  ;;  %v145_v55 = vadd.s32 127, %v144_v52 }
  0xc5   :  { %v143_v56 = vor.u32 %v142_v54, %v141_v53  ;;  %v146_v57 = vshll.u32 %v145_v55, 23 }
  0xc7   :  { %v147_v58 = vor.u32 4788187, %v146_v57  ;;  %v150_v60 = vcvt.s32.f32 %v143_v56 }
  0xc9   :  { %v148_v59 = vand.u32 2147483647, %v147_v58 }
  0xcb   :  { %v151_v61 = vmul.f32 %v150_v60, %v148_v59 }
  0xcd   :  { %v152_v63 = vxor.u32 2147483648, %v151_v61 }
  0xcf   :  { %v153_v0 = vsel %vm70_vm8, %v152_v63, %v151_v61 }
  0xd0   :  { %v156_v2 = vsel %vm69_vm9, %v302_v41, %v153_v0 }
  0xd1   :  { %250 = vcosq.f32 %v156_v2 }
  0xd2   :  { %252 = vsinq.f32 %v156_v2 }
  0xdb   :  { %v251_v6 = vpop.eup %250 }
  0xdc   :  { %v253_v7 = vpop.eup %252  ;;  %v168_v8 = vxor.u32 2147483648, %v251_v6 }
  0xdd   :  { %v165_v9 = vxor.u32 2147483648, %v253_v7 }
  0xde   :  { %v169_v10 = vsel %vm167_vm10, %v168_v8, %v253_v7 }
  0xdf   :  { %v166_v11 = vsel %vm164_vm11, %v251_v6, %v165_v9 }
  0xe0   :  { %v170_v47 = vsel %vm163_vm12, %v166_v11, %v169_v10 }
  0xe1   :  { %v171_v12 = vsel %vm160_vm13, nan, %v170_v47 }
  0xe2   :  { %v216_v13 = vmul.f32 %v306_v51, %v171_v12 }
  0xe4   :  { %217 = vst [vmem:[%s333_s4] sm:$0xff] %v216_v13 }

</bundles_post_ra>
